<compile_context>
chip_gen: v7x
topology: tpu7x:2x2x1
jax: 0.10.0
libtpu: 0.0.40
codegen_flags: <defaults>
</compile_context>

<pallas_src>
import functools
import math

import jax
import jax.numpy as jnp
from jax.experimental import pallas as pl
from jax.experimental.pallas import tpu as pltpu


def _round_up(x, m):
    return (x + m - 1) // m * m


def _tokenizer_kernel(*refs, n_part, leaky_slope):
    """One row-tile of the fused tokenizer MLP (all f32).

    refs (in order):
      x_0 .. x_{n_part-1}   [TM, d_k]   non-latent feature tiles
      x_lat                 [TM, L]     latent feature tile
      wp_0 .. wp_{n_part-1} [d_k, H]    row-slices of part_info_fc weight
      wl                    [L, H]      latent_code_fc weight
      bp, bl                [1, H]      biases
      wc_p, wc_l            [H, D]      combine_fc weight split at H
      bc                    [1, D]      combine_fc bias
      out                   [TM, D]
    """
    n_feats = n_part + 1
    x_refs = refs[:n_feats]
    idx = n_feats
    wp_refs = refs[idx:idx + n_part]; idx += n_part
    wl_ref = refs[idx]; idx += 1
    bp_ref = refs[idx]; idx += 1
    bl_ref = refs[idx]; idx += 1
    wcp_ref = refs[idx]; idx += 1
    wcl_ref = refs[idx]; idx += 1
    bc_ref = refs[idx]; idx += 1
    out_ref = refs[idx]

    # part_info_fc: accumulate per-key partial dots (== Linear over the concat).
    hp = jnp.dot(x_refs[0][...], wp_refs[0][...],
                 preferred_element_type=jnp.float32)
    for k in range(1, n_part):
        hp += jnp.dot(x_refs[k][...], wp_refs[k][...],
                      preferred_element_type=jnp.float32)
    hp += bp_ref[...]

    # latent_code_fc
    hl = jnp.dot(x_refs[n_part][...], wl_ref[...],
                 preferred_element_type=jnp.float32) + bl_ref[...]

    # LeakyReLU per half (slope == 0.0 gives plain ReLU, matching the module's
    # `nn.LeakyReLU(leaky_relu) if leaky_relu else nn.ReLU()`).
    ap = jnp.where(hp > 0, hp, leaky_slope * hp)
    al = jnp.where(hl > 0, hl, leaky_slope * hl)

    # combine_fc over the (implicit) concat: out = ap @ wc[:H] + al @ wc[H:] + bc
    out = (jnp.dot(ap, wcp_ref[...], preferred_element_type=jnp.float32)
           + jnp.dot(al, wcl_ref[...], preferred_element_type=jnp.float32)
           + bc_ref[...])
    out_ref[...] = out.astype(out_ref.dtype)


def prepare_tokenizer_params(params, structure):
    """One-time parameter preparation (hoisted out of the per-call path)."""
    non_latent_keys = tuple(structure['non_latent_info'].keys())
    dims = tuple(int(structure['non_latent_info'][k]) for k in non_latent_keys)

    wp, bp = params['part_info_fc']       # [P, H], [H]
    wl, bl = params['latent_code_fc']     # [L, H], [H]
    wc, bc = params['combine_fc']         # [2H, D], [D]
    H = int(wp.shape[1])
    D = int(wc.shape[1])

    wp_slices = []
    off = 0
    for d in dims:
        wp_slices.append(jnp.asarray(wp[off:off + d], jnp.float32))
        off += d

    return dict(
        non_latent_keys=non_latent_keys,
        dims=dims,
        H=H,
        D=D,
        wp_slices=tuple(wp_slices),
        wl=jnp.asarray(wl, jnp.float32),
        bp=jnp.asarray(bp, jnp.float32).reshape(1, H),
        bl=jnp.asarray(bl, jnp.float32).reshape(1, H),
        wc_p=jnp.asarray(wc[:H], jnp.float32),
        wc_l=jnp.asarray(wc[H:], jnp.float32),
        bc=jnp.asarray(bc, jnp.float32).reshape(1, D),
    )


def native_mlp_tokenizer_forward(raw_parts, prepared, leaky_relu, *, row_tile=4096):
    """Pallas-backed forward. Returns (dfn, dfn_fa, x) like the PyTorch module."""
    keys = prepared['non_latent_keys']
    dims = list(prepared['dims'])
    H, D = prepared['H'], prepared['D']

    feats = [raw_parts[k] for k in keys] + [raw_parts['latent']]
    L = int(feats[-1].shape[-1])
    all_dims = dims + [L]
    P = sum(dims)

    lead_shape = feats[0].shape[:-1]
    M = math.prod(lead_shape) if lead_shape else 1

    # Flat (M, d) views — free reshapes, no padding, no copies.
    xs = [f.reshape(M, d) for f, d in zip(feats, all_dims)]

    # Row tile: multiple of 8 (f32 sublanes), capped by row_tile, and capped at
    # ceil(M/2) so the grid has >= 2 steps (keeps both v7x TensorCores busy).
    tm = max(8, min(int(row_tile), _round_up(pl.cdiv(M, 2), 8)))
    grid = (pl.cdiv(M, tm),)

    const_inputs = [*prepared['wp_slices'], prepared['wl'],
                    prepared['bp'], prepared['bl'],
                    prepared['wc_p'], prepared['wc_l'], prepared['bc']]

    in_specs = (
        [pl.BlockSpec((tm, d), lambda i: (i, 0)) for d in all_dims]
        + [pl.BlockSpec(a.shape, lambda i: (0, 0)) for a in const_inputs]
    )
    out_spec = pl.BlockSpec((tm, D), lambda i: (i, 0))

    # Advisory cost estimate for XLA scheduling.
    flops = 2 * M * ((P + L) * H + 2 * H * D)
    act_bytes = sum(int(x.size) * x.dtype.itemsize for x in xs)
    weight_bytes = sum(int(a.size) * a.dtype.itemsize for a in const_inputs)
    out_bytes = M * D * 4
    bytes_accessed = act_bytes + weight_bytes + out_bytes

    # VMEM budget: double-buffered activation + output tiles, resident weights,
    # f32 hidden/out temporaries; 2x safety factor, capped at 40 MiB (safe on
    # v7x's 64 MiB physical VMEM, comfortable on v5e/v6e's 128 MiB).
    tile_in = sum(tm * d * 4 for d in all_dims)
    tile_out = tm * D * 4
    tile_tmp = tm * 2 * H * 4 + tm * D * 4
    tile_bytes = 2 * (tile_in + tile_out) + tile_tmp
    vmem_limit = int(min(40 << 20, max(8 << 20, 2 * (tile_bytes + weight_bytes))))

    slope = float(leaky_relu) if leaky_relu else 0.0
    kernel = functools.partial(_tokenizer_kernel,
                               n_part=len(dims), leaky_slope=slope)

    x2d = pl.pallas_call(
        kernel,
        out_shape=jax.ShapeDtypeStruct((M, D), jnp.float32),
        grid=grid,
        in_specs=in_specs,
        out_specs=out_spec,
        compiler_params=pltpu.CompilerParams(
            dimension_semantics=("parallel",),
            vmem_limit_bytes=vmem_limit),
        cost_estimate=pl.CostEstimate(
            flops=int(flops), transcendentals=0,
            bytes_accessed=int(bytes_accessed)),
    )(*xs, *const_inputs)

    x = x2d.reshape(*lead_shape, D)
    return raw_parts['dfn'], raw_parts['dfn_fa'], x


def _init_linear(key, fan_in, fan_out):
    # Deterministic, PyTorch-style uniform(-1/sqrt(fan_in), 1/sqrt(fan_in)).
    kw, kb = jax.random.split(key)
    bound = 1.0 / (fan_in ** 0.5)
    w = jax.random.uniform(kw, (fan_in, fan_out), jnp.float32, -bound, bound)
    b = jax.random.uniform(kb, (fan_out,), jnp.float32, -bound, bound)
    return w, b


if __name__ == "__main__":
    # Module hyperparameters (small, consistent with the forward pass).
    structure = {'non_latent_info': {'position': 8, 'size': 8}}   # part_info_dim = 16
    d_model = 32
    hidden_dim = 32
    latent_code_dim = 16
    leaky_relu = 0.2
    drop_out = 0.1  # identity in eval mode

    part_info_dim = sum(structure['non_latent_info'].values())

    key = jax.random.PRNGKey(0)
    k_pos, k_size, k_lat, k_dfn, k_dfnfa, k_w1, k_w2, k_w3 = jax.random.split(key, 8)

    batch, num_parts = 2, 8  # M = 16 token rows
    raw_parts = {
        'position': jax.random.normal(k_pos, (batch, num_parts, 8), jnp.float32),
        'size': jax.random.normal(k_size, (batch, num_parts, 8), jnp.float32),
        'latent': jax.random.normal(k_lat, (batch, num_parts, latent_code_dim), jnp.float32),
        'dfn': jax.random.randint(k_dfn, (batch, num_parts), 0, 10),
        'dfn_fa': jax.random.randint(k_dfnfa, (batch, num_parts), 0, 10),
    }

    params = {
        'part_info_fc': _init_linear(k_w1, part_info_dim, hidden_dim),
        'latent_code_fc': _init_linear(k_w2, latent_code_dim, hidden_dim),
        'combine_fc': _init_linear(k_w3, hidden_dim * 2, d_model),
    }

    # One-time parameter preparation (hoisted out of the per-call path).
    prepared = prepare_tokenizer_params(params, structure)

    dfn, dfn_fa, x = native_mlp_tokenizer_forward(raw_parts, prepared, leaky_relu)
    jax.block_until_ready((dfn, dfn_fa, x))

    # Pure-JAX f32 reference check. The kernel keeps f32 end-to-end; tolerance
    # only covers the MXU's default-precision matmul decomposition.
    pt = jnp.concatenate([raw_parts['position'], raw_parts['size']], axis=-1)
    hp = pt @ params['part_info_fc'][0] + params['part_info_fc'][1]
    hl = raw_parts['latent'] @ params['latent_code_fc'][0] + params['latent_code_fc'][1]
    h = jnp.concatenate([hp, hl], axis=-1)
    h = jnp.where(h > 0, h, leaky_relu * h)
    x_ref = h @ params['combine_fc'][0] + params['combine_fc'][1]
    assert x.shape == (batch, num_parts, d_model)
    assert jnp.allclose(x, x_ref, atol=2e-2, rtol=2e-2), "mismatch vs reference"

    print("KERNEL_OK")
</pallas_src>

<mosaic_0001>
module attributes {stable_mosaic.version = 11 : i64} {
  func.func @_tokenizer_kernel(%arg0: i32, %arg1: memref<8x8xf32, #tpu.memory_space<vmem>>, %arg2: memref<8x8xf32, #tpu.memory_space<vmem>>, %arg3: memref<8x16xf32, #tpu.memory_space<vmem>>, %arg4: memref<8x32xf32, #tpu.memory_space<vmem>>, %arg5: memref<8x32xf32, #tpu.memory_space<vmem>>, %arg6: memref<16x32xf32, #tpu.memory_space<vmem>>, %arg7: memref<1x32xf32, #tpu.memory_space<vmem>>, %arg8: memref<1x32xf32, #tpu.memory_space<vmem>>, %arg9: memref<32x32xf32, #tpu.memory_space<vmem>>, %arg10: memref<32x32xf32, #tpu.memory_space<vmem>>, %arg11: memref<1x32xf32, #tpu.memory_space<vmem>>, %arg12: memref<8x32xf32, #tpu.memory_space<vmem>>) attributes {dimension_semantics = [#tpu.dimension_semantics<parallel>], iteration_bounds = array<i64: 2>, scalar_prefetch = 0 : i64, scratch_operands = 0 : i64, tpu.core_type = #tpu.core_type<tc>, window_params = [{transform_indices = @transform_0, window_bounds = array<i64: 8, 8>}, {transform_indices = @transform_1, window_bounds = array<i64: 8, 8>}, {transform_indices = @transform_2, window_bounds = array<i64: 8, 16>}, {pipeline_mode = #tpu.pipeline_mode<synchronous>, transform_indices = @transform_3, window_bounds = array<i64: 8, 32>}, {pipeline_mode = #tpu.pipeline_mode<synchronous>, transform_indices = @transform_4, window_bounds = array<i64: 8, 32>}, {pipeline_mode = #tpu.pipeline_mode<synchronous>, transform_indices = @transform_5, window_bounds = array<i64: 16, 32>}, {pipeline_mode = #tpu.pipeline_mode<synchronous>, transform_indices = @transform_6, window_bounds = array<i64: 1, 32>}, {pipeline_mode = #tpu.pipeline_mode<synchronous>, transform_indices = @transform_7, window_bounds = array<i64: 1, 32>}, {pipeline_mode = #tpu.pipeline_mode<synchronous>, transform_indices = @transform_8, window_bounds = array<i64: 32, 32>}, {pipeline_mode = #tpu.pipeline_mode<synchronous>, transform_indices = @transform_9, window_bounds = array<i64: 32, 32>}, {pipeline_mode = #tpu.pipeline_mode<synchronous>, transform_indices = @transform_10, window_bounds = array<i64: 1, 32>}, {transform_indices = @transform_11, window_bounds = array<i64: 8, 32>}]} {
    %c0 = arith.constant 0 : index
    %c0_0 = arith.constant 0 : index
    %0 = vector.load %arg1[%c0, %c0_0] : memref<8x8xf32, #tpu.memory_space<vmem>>, vector<8x8xf32>
    %c0_1 = arith.constant 0 : index
    %c0_2 = arith.constant 0 : index
    %1 = vector.load %arg4[%c0_1, %c0_2] : memref<8x32xf32, #tpu.memory_space<vmem>>, vector<8x32xf32>
    %cst = arith.constant dense<0.000000e+00> : vector<8x32xf32>
    %2 = tpu.matmul %0, %1, %cst {dimension_numbers = #tpu.dot_dimension_numbers<[1], [0], [0], [1], [0, 0, 1, 1], [], []>} : vector<8x8xf32>, vector<8x32xf32>, vector<8x32xf32> -> vector<8x32xf32>
    %c0_3 = arith.constant 0 : index
    %c0_4 = arith.constant 0 : index
    %3 = vector.load %arg2[%c0_3, %c0_4] : memref<8x8xf32, #tpu.memory_space<vmem>>, vector<8x8xf32>
    %c0_5 = arith.constant 0 : index
    %c0_6 = arith.constant 0 : index
    %4 = vector.load %arg5[%c0_5, %c0_6] : memref<8x32xf32, #tpu.memory_space<vmem>>, vector<8x32xf32>
    %cst_7 = arith.constant dense<0.000000e+00> : vector<8x32xf32>
    %5 = tpu.matmul %3, %4, %cst_7 {dimension_numbers = #tpu.dot_dimension_numbers<[1], [0], [0], [1], [0, 0, 1, 1], [], []>} : vector<8x8xf32>, vector<8x32xf32>, vector<8x32xf32> -> vector<8x32xf32>
    %6 = arith.addf %2, %5 : vector<8x32xf32>
    %c0_8 = arith.constant 0 : index
    %c0_9 = arith.constant 0 : index
    %7 = vector.load %arg7[%c0_8, %c0_9] : memref<1x32xf32, #tpu.memory_space<vmem>>, vector<1x32xf32>
    %8 = vector.broadcast %7 : vector<1x32xf32> to vector<8x32xf32>
    %9 = arith.addf %6, %8 : vector<8x32xf32>
    %c0_10 = arith.constant 0 : index
    %c0_11 = arith.constant 0 : index
    %10 = vector.load %arg3[%c0_10, %c0_11] : memref<8x16xf32, #tpu.memory_space<vmem>>, vector<8x16xf32>
    %c0_12 = arith.constant 0 : index
    %c0_13 = arith.constant 0 : index
    %11 = vector.load %arg6[%c0_12, %c0_13] : memref<16x32xf32, #tpu.memory_space<vmem>>, vector<16x32xf32>
    %cst_14 = arith.constant dense<0.000000e+00> : vector<8x32xf32>
    %12 = tpu.matmul %10, %11, %cst_14 {dimension_numbers = #tpu.dot_dimension_numbers<[1], [0], [0], [1], [0, 0, 1, 1], [], []>} : vector<8x16xf32>, vector<16x32xf32>, vector<8x32xf32> -> vector<8x32xf32>
    %c0_15 = arith.constant 0 : index
    %c0_16 = arith.constant 0 : index
    %13 = vector.load %arg8[%c0_15, %c0_16] : memref<1x32xf32, #tpu.memory_space<vmem>>, vector<1x32xf32>
    %14 = vector.broadcast %13 : vector<1x32xf32> to vector<8x32xf32>
    %15 = arith.addf %12, %14 : vector<8x32xf32>
    %cst_17 = arith.constant 0.000000e+00 : f32
    %16 = vector.broadcast %cst_17 : f32 to vector<8x32xf32>
    %17 = arith.cmpf ogt, %9, %16 : vector<8x32xf32>
    %cst_18 = arith.constant 2.000000e-01 : f32
    %18 = vector.broadcast %cst_18 : f32 to vector<8x32xf32>
    %19 = arith.mulf %18, %9 : vector<8x32xf32>
    %20 = arith.select %17, %9, %19 : vector<8x32xi1>, vector<8x32xf32>
    %cst_19 = arith.constant 0.000000e+00 : f32
    %21 = vector.broadcast %cst_19 : f32 to vector<8x32xf32>
    %22 = arith.cmpf ogt, %15, %21 : vector<8x32xf32>
    %cst_20 = arith.constant 2.000000e-01 : f32
    %23 = vector.broadcast %cst_20 : f32 to vector<8x32xf32>
    %24 = arith.mulf %23, %15 : vector<8x32xf32>
    %25 = arith.select %22, %15, %24 : vector<8x32xi1>, vector<8x32xf32>
    %c0_21 = arith.constant 0 : index
    %c0_22 = arith.constant 0 : index
    %26 = vector.load %arg9[%c0_21, %c0_22] : memref<32x32xf32, #tpu.memory_space<vmem>>, vector<32x32xf32>
    %cst_23 = arith.constant dense<0.000000e+00> : vector<8x32xf32>
    %27 = tpu.matmul %20, %26, %cst_23 {dimension_numbers = #tpu.dot_dimension_numbers<[1], [0], [0], [1], [0, 0, 1, 1], [], []>} : vector<8x32xf32>, vector<32x32xf32>, vector<8x32xf32> -> vector<8x32xf32>
    %c0_24 = arith.constant 0 : index
    %c0_25 = arith.constant 0 : index
    %28 = vector.load %arg10[%c0_24, %c0_25] : memref<32x32xf32, #tpu.memory_space<vmem>>, vector<32x32xf32>
    %cst_26 = arith.constant dense<0.000000e+00> : vector<8x32xf32>
    %29 = tpu.matmul %25, %28, %cst_26 {dimension_numbers = #tpu.dot_dimension_numbers<[1], [0], [0], [1], [0, 0, 1, 1], [], []>} : vector<8x32xf32>, vector<32x32xf32>, vector<8x32xf32> -> vector<8x32xf32>
    %30 = arith.addf %27, %29 : vector<8x32xf32>
    %c0_27 = arith.constant 0 : index
    %c0_28 = arith.constant 0 : index
    %31 = vector.load %arg11[%c0_27, %c0_28] : memref<1x32xf32, #tpu.memory_space<vmem>>, vector<1x32xf32>
    %32 = vector.broadcast %31 : vector<1x32xf32> to vector<8x32xf32>
    %33 = arith.addf %30, %32 : vector<8x32xf32>
    %c0_29 = arith.constant 0 : index
    %c0_30 = arith.constant 0 : index
    %34 = vector.load %arg12[%c0_29, %c0_30] : memref<8x32xf32, #tpu.memory_space<vmem>>, vector<8x32xf32>
    tpu.vector_store %arg12[%c0_29, %c0_30], %33 {strides = array<i32>} : memref<8x32xf32, #tpu.memory_space<vmem>>, vector<8x32xf32>,
    return
  }
  func.func @transform_0(%arg0: i32) -> (i32, i32) {
    %c0_i32 = arith.constant 0 : i32
    %c0_i32_0 = arith.constant 0 : i32
    return %arg0, %c0_i32 : i32, i32
  }
  func.func @transform_1(%arg0: i32) -> (i32, i32) {
    %c0_i32 = arith.constant 0 : i32
    %c0_i32_0 = arith.constant 0 : i32
    return %arg0, %c0_i32 : i32, i32
  }
  func.func @transform_2(%arg0: i32) -> (i32, i32) {
    %c0_i32 = arith.constant 0 : i32
    %c0_i32_0 = arith.constant 0 : i32
    return %arg0, %c0_i32 : i32, i32
  }
  func.func @transform_3(%arg0: i32) -> (i32, i32) {
    %c0_i32 = arith.constant 0 : i32
    %c0_i32_0 = arith.constant 0 : i32
    %c0_i32_1 = arith.constant 0 : i32
    return %c0_i32, %c0_i32_0 : i32, i32
  }
  func.func @transform_4(%arg0: i32) -> (i32, i32) {
    %c0_i32 = arith.constant 0 : i32
    %c0_i32_0 = arith.constant 0 : i32
    %c0_i32_1 = arith.constant 0 : i32
    return %c0_i32, %c0_i32_0 : i32, i32
  }
  func.func @transform_5(%arg0: i32) -> (i32, i32) {
    %c0_i32 = arith.constant 0 : i32
    %c0_i32_0 = arith.constant 0 : i32
    %c0_i32_1 = arith.constant 0 : i32
    return %c0_i32, %c0_i32_0 : i32, i32
  }
  func.func @transform_6(%arg0: i32) -> (i32, i32) {
    %c0_i32 = arith.constant 0 : i32
    %c0_i32_0 = arith.constant 0 : i32
    %c0_i32_1 = arith.constant 0 : i32
    return %c0_i32, %c0_i32_0 : i32, i32
  }
  func.func @transform_7(%arg0: i32) -> (i32, i32) {
    %c0_i32 = arith.constant 0 : i32
    %c0_i32_0 = arith.constant 0 : i32
    %c0_i32_1 = arith.constant 0 : i32
    return %c0_i32, %c0_i32_0 : i32, i32
  }
  func.func @transform_8(%arg0: i32) -> (i32, i32) {
    %c0_i32 = arith.constant 0 : i32
    %c0_i32_0 = arith.constant 0 : i32
    %c0_i32_1 = arith.constant 0 : i32
    return %c0_i32, %c0_i32_0 : i32, i32
  }
  func.func @transform_9(%arg0: i32) -> (i32, i32) {
    %c0_i32 = arith.constant 0 : i32
    %c0_i32_0 = arith.constant 0 : i32
    %c0_i32_1 = arith.constant 0 : i32
    return %c0_i32, %c0_i32_0 : i32, i32
  }
  func.func @transform_10(%arg0: i32) -> (i32, i32) {
    %c0_i32 = arith.constant 0 : i32
    %c0_i32_0 = arith.constant 0 : i32
    %c0_i32_1 = arith.constant 0 : i32
    return %c0_i32, %c0_i32_0 : i32, i32
  }
  func.func @transform_11(%arg0: i32) -> (i32, i32) {
    %c0_i32 = arith.constant 0 : i32
    %c0_i32_0 = arith.constant 0 : i32
    return %arg0, %c0_i32 : i32, i32
  }
}

</mosaic_0001>

<bundles_post_ra>
// kernel: tpu_custom_call.1
= control target key start
LH: loop header
LB: loop body
LE: loop exit
PB: predicated region body
PF: predicated region fallthrough
CT: control target
= control target key end

     0   :  { %s1774_s0 = inlined_call_operand.vmem [shape: f32[16,8], index: 0, kind: input, shape index: {}]   ;;  %s1775_s1 = inlined_call_operand.vmem [shape: f32[16,8], index: 1, kind: input, shape index: {}]   ;;  %s1776_s2 = inlined_call_operand.hbm [shape: f32[16,16], index: 2, kind: input, shape index: {}]   ;;  %s1777_s3 = inlined_call_operand.hbm [shape: f32[8,32], index: 3, kind: input, shape index: {}]   ;;  %s1778_s4 = inlined_call_operand.hbm [shape: f32[8,32], index: 4, kind: input, shape index: {}]   ;;  %s1779_s5 = inlined_call_operand.hbm [shape: f32[16,32], index: 5, kind: input, shape index: {}]   ;;  %s1780_s6 = inlined_call_operand.vmem [shape: f32[1,32], index: 6, kind: input, shape index: {}]   ;;  %s1781_s7 = inlined_call_operand.vmem [shape: f32[1,32], index: 7, kind: input, shape index: {}]   ;;  %s1782_s8 = inlined_call_operand.vmem [shape: f32[32,32], index: 8, kind: input, shape index: {}]   ;;  %s1783_s9 = inlined_call_operand.vmem [shape: f32[32,32], index: 9, kind: input, shape index: {}]   ;;  %s1784_s10 = inlined_call_operand.vmem [shape: f32[1,32], index: 10, kind: input, shape index: {}]   ;;  %s1785_s11 = inlined_call_operand.hbm [shape: f32[16,32], index: 11, kind: output, shape index: {}]  }
   0x1   :  { %1792 = sst [smem:[#allocation17_spill]] %s1785_s11 }
   0x2   :  { %16 = vsyncpa [#allocation3], 0 }
   0x3   :  { %18 = vsyncpa [#allocation3 + $0x1], 0 }
   0x4   :  { %19 = vsyncpa [#allocation6], 0 }
   0x5   :  { %20 = vsyncpa [#allocation9], 0 }
   0x6   :  { %21 = vsyncpa [#allocation4], 0 }
   0x7   :  { %23 = vsyncpa [#allocation4 + $0x1], 0  ;;  %s1467_s17 = smov 0   ;;  %s1469_s18 = smov 0  }
   0x8   :  { %s1471_s19 = smov 0   ;;  %s1473_s20 = smov 0  }
   0x9 LB: > { %1793 = sst [smem:[#allocation15_spill]] %s1383_s17  ;;  %s1488_s21 = sadd.s32 4294967295, %s1395_s20   ;;  %s1395_s20 = sphi %s1473_s20, %s1817_s20   ;;  %s1391_s19 = sphi %s1471_s19, %s1816_s19   ;;  %s1387_s18 = sphi %s1469_s18, %s1815_s18   ;;  %s1383_s17 = sphi %s1467_s17, %s1814_s17  }
   0xa   : > { %s1026_s22 = sadd.s32 4294967294, %s1395_s20   ;;  %p101_p0 = scmp.ne.s32.totalorder %s1387_s18, %s1383_s17 }
   0xb   : > { %p1787_p1 = scmp.eq.s32.totalorder %s1488_s21, 0  ;;  %p299_p3 = scmp.eq.s32.totalorder %s1026_s22, 1 }
   0xc   : > { %p1027_p5 = scmp.ge.s32.totalorder %s1395_s20, 1  ;;  %p306_p7 = scmp.lt.s32.totalorder %s1395_s20, 3 }
   0xd   : > { %p1497_p4 = por %p1787_p1, %p101_p0  ;;  %p1502_p6 = por %p299_p3, %p101_p0 }
   0xe   : > { %p1507_p8 = pnand %p1027_p5, %p306_p7  ;;  %s1397_s26 = smov [#allocation5]  }
   0xf   : > { %s1794_s23 = scalar_select %p1497_p4, 1, 0 }
  0x10   : > { %s1795_s24 = scalar_select %p1502_p6, 1, 0 }
  0x11   : > { %s1797_s25 = scalar_select %p1507_p8, 1, 0 }
  0x12   : > { %1796 = sst [smem:[#allocation16_spill]] %s1795_s24  ;;  %s319_s27 = sshll.u32 %s1397_s26, 4  ;;  %s320_s27 = int_to_ptr.vmem [resolvable:$true] %s319_s27 }
  0x13   : > { %p1141_p10 = pneg %p1507_p8  ;;  %s1398_s28 = smov [#allocation7]  }
  0x14   : > { %s330_s29 = sshll.u32 %s1398_s28, 4  ;;  %s1399_s12 = smov [#allocation8]   ;;  %s1520_s29 = int_to_ptr.vmem [resolvable:$true] %s330_s29 }
  0x15   : > { %p1516_p11 = pnand %p1141_p10, %p1787_p1  ;;  %s340_s13 = sshll.u32 %s1399_s12, 4  ;;  %s1522_s13 = int_to_ptr.vmem [resolvable:$true] %s340_s13 }
  0x16   : > { %s1207_s16 = scalar_lea.hbm %s1777_s3, 128 }
  0x17   : > { %p1208_p12 = scmp.ne.s32.totalorder %s1777_s3, %s1207_s16  ;;  %p1532_p13 = pneg %p1516_p11 }
  0x18   : > { %p1214_p5 = scmp.lt.u32.totalorder %s1207_s16, %s1777_s3 }
  0x19   : > { %p1210_p0 = pnand %p1532_p13, %p1208_p12 }
  0x1b   : > { %p1211_p3 = pneg %p1210_p0 }
  0x1d   : > { %p1216_p7 = pnand %p1214_p5, %p1211_p3 }
  0x1f   : > { %1219 = shalt.err (!%p1216_p7)
}
  0x20   : > { %s1220_s14 = scalar_lea.vmem %s320_s27, 128  ;;  %p1228_p2 = scmp.lt.s32.totalorder %s320_s27, %s320_s27 }
  0x21   : > { %p1221_p10 = scmp.ne.s32.totalorder %s320_s27, %s1220_s14  ;;  %p1229_p6 = scmp.lt.s32.totalorder %s1220_s14, %s1220_s14 }
  0x23   : > { %p1223_p9 = pnand %p1221_p10, %p1532_p13  ;;  %p1230_p4 = por %p1229_p6, %p1228_p2 }
  0x25   : > { %p1224_p1 = pneg %p1223_p9 }
  0x27   : > { %p1231_p8 = pnand %p1230_p4, %p1224_p1 }
  0x29   : > { %1234 = shalt.err (!%p1231_p8)
}
  0x2a   : > { %1144 = dma.hbm_to_vmem [thread:$0]  (!%p1516_p11), %s1777_s3, 128, %s320_s27, [#allocation6]  }
  0x2b   : > { %s1235_s26 = scalar_lea.hbm %s1778_s4, 128 }
  0x2c   : > { %p1236_p9 = scmp.ne.s32.totalorder %s1778_s4, %s1235_s26  ;;  %p1242_p1 = scmp.lt.u32.totalorder %s1235_s26, %s1778_s4 }
  0x2e   : > { %p1238_p12 = pnand %p1236_p9, %p1532_p13 }
  0x30   : > { %p1239_p2 = pneg %p1238_p12 }
  0x32   : > { %p1244_p4 = pnand %p1242_p1, %p1239_p2 }
  0x34   : > { %1247 = shalt.err (!%p1244_p4)
}
  0x35   : > { %s1248_s27 = scalar_lea.vmem %s1520_s29, 128  ;;  %p1256_p3 = scmp.lt.s32.totalorder %s1520_s29, %s1520_s29 }
  0x36   : > { %p1249_p6 = scmp.ne.s32.totalorder %s1520_s29, %s1248_s27  ;;  %p1257_p5 = scmp.lt.s32.totalorder %s1248_s27, %s1248_s27 }
  0x38   : > { %p1251_p8 = pnand %p1249_p6, %p1532_p13  ;;  %p1258_p7 = por %p1257_p5, %p1256_p3 }
  0x3a   : > { %p1252_p0 = pneg %p1251_p8 }
  0x3c   : > { %p1259_p10 = pnand %p1258_p7, %p1252_p0 }
  0x3e   : > { %1262 = shalt.err (!%p1259_p10)
}
  0x3f   : > { %1147 = dma.hbm_to_vmem [thread:$0]  (!%p1516_p11), %s1778_s4, 128, %s1520_s29, [#allocation6]  }
  0x40   : > { %s1263_s24 = scalar_lea.hbm %s1779_s5, 256 }
  0x41   : > { %p1264_p9 = scmp.ne.s32.totalorder %s1779_s5, %s1263_s24  ;;  %p1270_p1 = scmp.lt.u32.totalorder %s1263_s24, %s1779_s5 }
  0x43   : > { %p1266_p12 = pnand %p1264_p9, %p1532_p13 }
  0x45   : > { %p1267_p2 = pneg %p1266_p12 }
  0x47   : > { %p1272_p4 = pnand %p1270_p1, %p1267_p2 }
  0x49   : > { %1275 = shalt.err (!%p1272_p4)
}
  0x4a   : > { %s1276_s29 = scalar_lea.vmem %s1522_s13, 256  ;;  %p1284_p3 = scmp.lt.s32.totalorder %s1522_s13, %s1522_s13 }
  0x4b   : > { %p1277_p6 = scmp.ne.s32.totalorder %s1522_s13, %s1276_s29  ;;  %p1285_p5 = scmp.lt.s32.totalorder %s1276_s29, %s1276_s29 }
  0x4d   : > { %p1279_p8 = pnand %p1277_p6, %p1532_p13  ;;  %p1286_p7 = por %p1285_p5, %p1284_p3 }
  0x4f   : > { %p1280_p0 = pneg %p1279_p8 }
  0x51   : > { %p1287_p10 = pnand %p1286_p7, %p1280_p0 }
  0x53   : > { %1290 = shalt.err (!%p1287_p10)
}
  0x54   : > { %s1400_s27 = smov 128   ;;  %s1401_s28 = smov 8  }
  0x55   : > { %1150 = dma.hbm_to_vmem [thread:$0]  (!%p1516_p11), %s1779_s5, 256, %s1522_s13, [#allocation9], %s1400_s27, %s1400_s27, %s1401_s28  }
  0x56   : > { %s1595_s15 = sadd.s32 1, %s1395_s20   ;;  %s88_s24 = sadd.s32 1, %s1391_s19 }
  0x57   : > { %s85_s22 = ssub.s32 %s1395_s20, %s1595_s15  ;;  %p95_p9 = scmp.ne.s32.totalorder %s1391_s19, %s1387_s18 }
  0x58   : > { %p86_p13 = scmp.eq.s32.totalorder %s85_s22, 0  ;;  %p96_p12 = scmp.eq.s32.totalorder %s1395_s20, 0 }
  0x59   : > { %p1162_p2 = scmp.lt.s32.totalorder %s1395_s20, 2  ;;  %p1800_p4 = scmp.eq.s32.totalorder %s1488_s21, 1 }
  0x5a   : > { %s1605_s16 = scalar_select %p86_p13, %s1391_s19, %s88_s24  }
  0x5b   : > { %p97_p1 = por %p96_p12, %p95_p9  ;;  %p1609_p6 = por %p1800_p4, %p95_p9 }
  0x5c   : > { %s383_s30 = sand.u32 1, %s1391_s19   ;;  %s1033_s12 = sshll.u32 %s1395_s20, 7 }
  0x5d   : > { %s1032_s13 = sshll.u32 %s383_s30, 3  ;;  %s1618_s27 = scalar_lea.hbm %s1776_s2, %s1033_s12 }
  0x5e   : > { %s387_s28 = scalar_lea.vmem [#allocation2], %s1032_s13  ;;  %p1620_p11 = pnand %p1162_p2, %p97_p1 }
  0x5f   : > { %s394_s11 = sshll.u32 %s387_s28, 4  ;;  %s384_s22 = scalar_lea.sflag [#allocation3], %s383_s30  ;;  %s1624_s11 = int_to_ptr.vmem [resolvable:$true] %s394_s11 }
  0x60   : > { %s1291_s24 = scalar_lea.hbm %s1618_s27, 128  ;;  %p1293_p0 = pneg %p1620_p11 }
  0x61   : > { %p1292_p8 = scmp.ne.s32.totalorder %s1618_s27, %s1291_s24  ;;  %s1296_s14 = scalar_lea.hbm %s1776_s2, 256 }
  0x62   : > { %p1297_p7 = scmp.lt.u32.totalorder %s1618_s27, %s1776_s2  ;;  %p1298_p10 = scmp.lt.u32.totalorder %s1296_s14, %s1291_s24 }
  0x63   : > { %p1294_p3 = pnand %p1293_p0, %p1292_p8  ;;  %p1300_p9 = scmp.lt.u32.totalorder %s1291_s24, %s1618_s27 }
  0x64   : > { %p1299_p13 = por %p1298_p10, %p1297_p7 }
  0x65   : > { %p1295_p5 = pneg %p1294_p3 }
  0x66   : > { %p1301_p12 = por %p1300_p9, %p1299_p13 }
  0x68   : > { %p1302_p2 = pnand %p1301_p12, %p1295_p5 }
  0x6a   : > { %1305 = shalt.err (!%p1302_p2)
}
  0x6b   : > { %s1306_s30 = scalar_lea.vmem %s1624_s11, 128  ;;  %s1402_s12 = smov [#allocation2]  }
  0x6c   : > { %p1307_p1 = scmp.ne.s32.totalorder %s1624_s11, %s1306_s30  ;;  %s1311_s13 = sshll.u32 %s1402_s12, 4  ;;  %s1312_s13 = int_to_ptr.vmem [resolvable:$false] %s1311_s13 }
  0x6d   : > { %s1313_s29 = scalar_lea.vmem %s1312_s13, 256  ;;  %p1314_p3 = scmp.lt.s32.totalorder %s1624_s11, %s1312_s13 }
  0x6e   : > { %p1309_p4 = pnand %p1307_p1, %p1293_p0  ;;  %p1315_p7 = scmp.lt.s32.totalorder %s1313_s29, %s1306_s30 }
  0x70   : > { %p1310_p8 = pneg %p1309_p4  ;;  %p1316_p10 = por %p1315_p7, %p1314_p3 }
  0x72   : > { %p1317_p13 = pnand %p1316_p10, %p1310_p8 }
  0x74   : > { %1320 = shalt.err (!%p1317_p13)
}
  0x75   : > { %1154 = dma.hbm_to_vmem [thread:$0]  (!%p1620_p11), %s1618_s27, 128, %s1624_s11, %s384_s22  }
  0x76   : > { %p1803_p5 = scmp.ne.s32.totalorder %s1797_s25, 0 }
  0x77   : > { %s1654_s24 = sand.u32 (!%p1803_p5), 1, %s1387_s18   ;;  %p1804_p0 = scmp.ne.s32.totalorder (!%p1803_p5), %s1794_s23, 0 }
  0x78   : > { %403 = sbr.rel (%p1803_p5) target bundleno = 594 (0x252), region = 64  ;;  %s1035_s14 = sshll.u32 (!%p1803_p5), %s1654_s24, 3 }
  0x79   : > { %s406_s28 = scalar_lea.sflag (!%p1803_p5), [#allocation3], %s1654_s24  ;;  %s1660_s30 = scalar_lea.vmem (!%p1803_p5), [#allocation2], %s1035_s14 }
  0x7f   : > { %1366 = dma.done.wait (%p1804_p0), %s406_s28, 128  }
  0x80   : > { %1368 = vsyncadd (%p1804_p0), %s406_s28, 4294967168  ;;  %p1805_p11 = scmp.eq.s32.totalorder %s1488_s21, 0 }
  0x82   : > { %1370 = dma.done.wait (%p1805_p11), [#allocation6], 256   ;;  %p1806_p9 = pmov %p1805_p11 }
  0x84   : > { %1372 = vsyncadd (%p1806_p9), [#allocation6], 4294967040  ;;  %p1807_p12 = pmov %p1806_p9 }
  0x85   : > { %p1808_p2 = pmov %p1806_p9 }
  0x86   : > { %1374 = dma.done.wait (%p1807_p12), [#allocation9], 256  }
  0x87   : > { %1376 = vsyncadd (%p1808_p2), [#allocation9], 4294967040  ;;  %p468_p1 = scmp.lt.s32.totalorder %s1488_s21, 1  ;;  %v1403_v0 = vmov 0.0   ;;  %vm1404_vm0 = vmmov 0   ;;  %vm480_vm1 = vcmask 64512  }
  0x88   : > { %1071 = vmatprep.subr.mxu0 %v1403_v0  ;;  %1076 = vmatprep.subr.mxu1 %v1403_v0  ;;  %v479_v1 = vld [vmem:[#allocation7] sm:$0xff]  ;;  %v477_v2 = vld [vmem:[#allocation5] sm:$0xff]  ;;  %v636_v5 = vld [vmem:[#allocation8] sm:$0xff]  ;;  %v1405_v8 = vmov 0.0|0.0   ;;  %vm645_vm2 = vcmask 130048   ;;  %vm733_vm4 = vcmask 261120  }
  0x89   : > { %1073 = vmatprep.mubr.msk.f32.mxu0 %vm1404_vm0, %v1403_v0  ;;  %1078 = vmatprep.mubr.msk.f32.mxu1 %vm1404_vm0, %v1403_v0  ;;  %s469_s23 = scalar_select %p468_p1, %s1488_s21, 1  ;;  %v637_v6 = vld [vmem:[#allocation8 + $0x8] sm:$0xff]  ;;  %v725_v10 = vld [vmem:[%s1782_s8] sm:$0xff]  ;;  %v727_v16 = vld [vmem:[%s1782_s8 + $0x10] sm:$0xff] }
  0x8a   : > { %1072 = vmatpush3.msra.mxu0 %v479_v1  ;;  %1077 = vmatpush3.msra.mxu1 %v477_v2  ;;  %v1111_v7 = vpack.c.bf16 %v637_v6, %v636_v5  ;;  %v635_v9 = vld [vmem:[%s1660_s30] sm:$0xff]  ;;  %v728_v17 = vld [vmem:[%s1782_s8 + $0x18] sm:$0xff]  ;;  %v731_v19 = vld [vmem:[%s1783_s9 + $0x10] sm:$0xff]  ;;  %s1051_s29 = sshll.u32 %s1488_s21, 7  ;;  %s467_s28 = scalar_lea.vmem [#allocation10], %s1035_s14 }
  0x8b   : > { %s1040_s25 = sshll.u32 %s469_s23, 3  ;;  %1110 = vmatprep.subr.bf16.mxu0 %v1405_v8  ;;  %1113 = vmatprep.subr.bf16.mxu1 %v1405_v8  ;;  %v726_v11 = vld [vmem:[%s1782_s8 + $0x8] sm:$0xff]  ;;  %v729_v13 = vld [vmem:[%s1783_s9] sm:$0xff]  ;;  %v1123_v18 = vpack.c.bf16 %v728_v17, %v727_v16  ;;  %v732_v20 = vld [vmem:[%s1783_s9 + $0x18] sm:$0xff]  ;;  %s903_s23 = sshll.u32 %s467_s28, 4  ;;  %s1731_s23 = int_to_ptr.vmem [resolvable:$true] %s903_s23 }
  0x8c   : > { %s475_s17 = scalar_lea.vmem %s1775_s1, %s1040_s25  ;;  %s471_s13 = scalar_lea.vmem %s1774_s0, %s1040_s25  ;;  %v1120_v12 = vpack.c.bf16 %v726_v11, %v725_v10  ;;  %v730_v14 = vld [vmem:[%s1783_s9 + $0x8] sm:$0xff]  ;;  %v1117_v21 = vpack.c.bf16 %v732_v20, %v731_v19  ;;  %v1044_v24 = vld [vmem:[%s1780_s6] ss:$0 sm:$0xff] }
  0x8d   : > { %v478_v3 = vld [vmem:[%s475_s17] sm:$0xff]  ;;  %v1114_v15 = vpack.c.bf16 %v730_v14, %v729_v13  ;;  %s1809_s11 = sld [smem:[#allocation17_spill]]  ;;  %s890_s17 = scalar_lea.sflag [#allocation4], %s1654_s24 }
  0x8e   : > { %v476_v4 = vld [vmem:[%s471_s13] sm:$0xff]  ;;  %1074 = vmatmul.mubr.msk.f32.vlgmr.msra.gmra.mrb[0].mxu0 %vm480_vm1, %v478_v3  ;;  %s1321_s21 = scalar_lea.vmem %s1731_s23, 128  ;;  %s1406_s14 = smov [#allocation10]  }
  0x8f   : > { %1079 = vmatmul.mubr.msk.f32.vlgmr.msra.gmra.mrb[0].mxu1 %vm480_vm1, %v476_v4  ;;  %1085 = vmatprep.mubr.msk.f32.mxu0 %vm1404_vm0, %v1403_v0  ;;  %v1045_v29 = vld [vmem:[%s1781_s7] ss:$0 sm:$0xff]  ;;  %p1322_p4 = scmp.ne.s32.totalorder %s1731_s23, %s1321_s21  ;;  %s1325_s22 = sshll.u32 %s1406_s14, 4  ;;  %s1326_s22 = int_to_ptr.vmem [resolvable:$false] %s1325_s22 }
  0x90   : > { %1112 = vmatpush3.bf16.msra.mxu0 %v1111_v7  ;;  %1096 = vmatprep.mubr.msk.f32.mxu1 %vm1404_vm0, %v1403_v0  ;;  %v1049_v40 = vld [vmem:[%s1784_s10] ss:$0 sm:$0xff]  ;;  %s1327_s12 = scalar_lea.vmem %s1326_s22, 256  ;;  %p1328_p7 = scmp.lt.s32.totalorder %s1731_s23, %s1326_s22 }
  0x91   : > { %1119 = vmatprep.subr.bf16.mxu0 %v1405_v8  ;;  %1115 = vmatpush3.bf16.msra.mxu1 %v1114_v15  ;;  %p1323_p8 = pnand %p1322_p4, %p1609_p6  ;;  %p1329_p10 = scmp.lt.s32.totalorder %s1327_s12, %s1321_s21 }
  0x92   : > { %1116 = vmatprep.subr.bf16.mxu1 %v1405_v8 }
  0x93   : > { %1086 = vmatmul.mubr.msk.f32.vlgmr.msra.gmra.mrb[2].mxu0 %vm645_vm2, %v635_v9  ;;  %s1729_s30 = scalar_lea.hbm %s1809_s11, %s1051_s29  ;;  %p1324_p3 = pneg %p1323_p8 }
  0x94   : > { %1107 = vmatprep.mubr.msk.f32.mxu0 %vm1404_vm0, %v1403_v0  ;;  %1121 = vmatpush3.bf16.msra.mxu0 %v1120_v12  ;;  %p1330_p13 = por %p1329_p10, %p1328_p7 }
  0x95   : > { %1122 = vmatprep.subr.bf16.mxu0 %v1405_v8  ;;  %1118 = vmatpush3.bf16.msra.mxu1 %v1117_v21 }
  0x96   : > { %p1331_p5 = pnand %p1330_p13, %p1324_p3 }
  0x98   : > { %1124 = vmatpush3.bf16.msra.mxu0 %v1123_v18 }
 0x161   : > { %v550_v22 = vpop.f32.mrb[0].mxu0 }
 0x162   : > { %v623_v23 = vpop.f32.mrb[0].mxu1  ;;  %v1075_v26 = vpop.f32.mrb[1].mxu0 }
 0x163   : > { %v624_v25 = vadd.f32 %v623_v23, %v550_v22  ;;  %v1080_v27 = vpop.f32.mrb[1].mxu1 }
 0x165   : > { %v634_v28 = vadd.f32 %v1044_v24, %v624_v25 }
 0x166   : > { %v715_v31 = vpop.f32.mrb[2].mxu0 }
 0x167   : > { %vm719_vm3 = vcmp.gt.f32.partialorder %v634_v28, 0.0  ;;  %v720_v30 = vmul.f32 0.2, %v634_v28  ;;  %v716_v32 = vadd.f32 %v1045_v29, %v715_v31  ;;  %v1087_v33 = vpop.f32.mrb[3].mxu0 }
 0x169   : > { %v721_v34 = vsel %vm719_vm3, %v634_v28, %v720_v30  ;;  %vm722_vm5 = vcmp.gt.f32.partialorder %v716_v32, 0.0  ;;  %v723_v35 = vmul.f32 0.2, %v716_v32 }
 0x16a   : > { %1108 = vmatmul.mubr.msk.f32.vlgmr.msra.gmra.mrb[4].mxu0 %vm733_vm4, %v721_v34 }
 0x16b   : > { %v724_v36 = vsel %vm722_vm5, %v716_v32, %v723_v35 }
 0x16c   : > { %1097 = vmatmul.mubr.msk.f32.vlgmr.msra.gmra.mrb[2].mxu1 %vm733_vm4, %v724_v36 }
 0x23d   : > { %v876_v37 = vpop.f32.mrb[4].mxu0 }
 0x23e   : > { %v1109_v38 = vpop.f32.mrb[5].mxu0 }
 0x23f   : > { %v803_v39 = vpop.f32.mrb[2].mxu1 }
 0x240   : > { %v877_v41 = vadd.f32 %v876_v37, %v803_v39  ;;  %v1098_v42 = vpop.f32.mrb[3].mxu1 }
 0x242   : > { %v887_v43 = vadd.f32 %v1049_v40, %v877_v41 }
 0x244   : > { %888 = vst.msk [vmem:[%s467_s28] sm:$0xff] %vm733_vm4, %v887_v43 }
 0x245   : > { %1334 = shalt.err (!%p1331_p5)
}
 0x246   : > { %s1335_s24 = scalar_lea.hbm %s1729_s30, 128  ;;  %s1339_s28 = scalar_lea.hbm %s1809_s11, 256 }
 0x247   : > { %p1336_p0 = scmp.ne.s32.totalorder %s1729_s30, %s1335_s24  ;;  %p1340_p12 = scmp.lt.u32.totalorder %s1729_s30, %s1809_s11 }
 0x248   : > { %p1341_p2 = scmp.lt.u32.totalorder %s1339_s28, %s1335_s24  ;;  %p1343_p4 = scmp.lt.u32.totalorder %s1335_s24, %s1729_s30 }
 0x249   : > { %p1337_p11 = pnand %p1336_p0, %p1609_p6 }
 0x24a   : > { %p1342_p1 = por %p1341_p2, %p1340_p12 }
 0x24b   : > { %p1338_p9 = pneg %p1337_p11 }
 0x24c   : > { %p1344_p8 = por %p1343_p4, %p1342_p1 }
 0x24e   : > { %p1345_p3 = pnand %p1344_p8, %p1338_p9 }
 0x250   : > { %1348 = shalt.err (!%p1345_p3)
}
 0x251   : > { %1139 = dma.vmem_to_hbm [thread:$0]  (%p1609_p6), %s1731_s23, 128, %s1729_s30, %s890_s17  }
 0x252 PF: > { %s1810_s21 = sld [smem:[#allocation15_spill]]  ;;  %s1811_s14 = sld [smem:[#allocation16_spill]] }
 0x253   : > { %p1813_p10 = scmp.ge.s32.totalorder %s1395_s20, 2 }
 0x258   : > { %s915_s22 = sand.u32 1, %s1810_s21   ;;  %p1812_p7 = scmp.ne.s32.totalorder %s1811_s14, 0 }
 0x259   : > { %s916_s12 = scalar_lea.sflag [#allocation4], %s915_s22 }
 0x25a   : > { %p1156_p13 = pnand %p1813_p10, %p1812_p7 }
 0x25c   : > { %1378 = dma.done.wait (!%p1156_p13), %s916_s12, 128  }
 0x25d   : > { %1380 = vsyncadd (!%p1156_p13), %s916_s12, 4294967168  ;;  %p26_p5 = scmp.ge.s32.totalorder %s1595_s15, 4   ;;  %s1814_s17 = smov %s1387_s18 }
 0x25e   : > { %s1815_s18 = smov %s1391_s19  ;;  %s1816_s19 = smov %s1605_s16 }
 0x25f   : > { %s1817_s20 = smov %s1595_s15  ;;  %28 = sbr.rel (!%p26_p5) target bundleno = 9 (0x9), region = 127 }
 0x266   :  { %921 = vsyncpa [#allocation3], 1 }
 0x267   :  { %923 = vsyncpa [#allocation3 + $0x1], 1 }
 0x268   :  { %924 = vsyncpa [#allocation6], 1 }
 0x269   :  { %925 = vsyncpa [#allocation9], 1 }
 0x26a   :  { %926 = vsyncpa [#allocation4], 1 }
 0x26b   :  { %928 = vsyncpa [#allocation4 + $0x1], 1 }

</bundles_post_ra>
